<compile_context>
chip_gen: v7x
topology: tpu7x:2x2x1
jax: 0.10.0
libtpu: 0.0.40
codegen_flags: <defaults>
</compile_context>

<pallas_src>
import jax
import jax.numpy as jnp
from jax.experimental import pallas as pl
from jax.experimental.pallas import tpu as pltpu


def _round_up(n: int, m: int) -> int:
    return ((n + m - 1) // m) * m


def _make_value_head_kernel(relu_clipping: bool):
    def kernel(x_ref, w1_ref, b1_ref, w2_ref, b2_ref, w3_ref, b3_ref, o_ref):
        x = x_ref[...]                                   # [TB, D]

        # Layer 1: Linear(D -> Hp) + ReLU   (MXU matmul, VPU add/max)
        h1 = jnp.dot(x, w1_ref[...], preferred_element_type=jnp.float32) + b1_ref[...]
        h1 = jnp.maximum(h1, 0.0)                        # [TB, Hp]

        # Layer 2: Linear(Hp -> Hp) + ReLU
        h2 = jnp.dot(h1, w2_ref[...], preferred_element_type=jnp.float32) + b2_ref[...]
        h2 = jnp.maximum(h2, 0.0)                        # [TB, Hp]

        # Layer 3: Linear(Hp -> 1). w3 is stored as a row (1, Hp); contracting
        # the feature axis of both operands (A @ B^T) yields the result directly
        # in a lane-dense (1, TB) layout -> unmasked full-width stores.
        val = jax.lax.dot_general(
            w3_ref[...], h2,
            dimension_numbers=(((1,), (1,)), ((), ())),
            preferred_element_type=jnp.float32,
        ) + b3_ref[...]                                  # [1, TB]

        if relu_clipping:
            val = jnp.maximum(val, 0.0)

        o_ref[...] = val.astype(o_ref.dtype)

    return kernel


def value_head_forward(x, params, *, relu_clipping: bool = False, block_b: int = 512):
    """x: [B, D] float32. params: dict with w1/b1/w2/b2/w3/b3. Returns [B, 1]."""
    assert block_b % 128 == 0, "batch tile must be lane-aligned for the (1, TB) output"
    B, D = x.shape
    H = params["w1"].shape[1]          # 2 * latent_dimension
    assert params["w1"].shape == (D, H)
    assert params["b1"].shape == (H,)
    assert params["w2"].shape == (H, H)
    assert params["b2"].shape == (H,)
    assert params["w3"].shape == (H, 1)
    assert params["b3"].shape == (1,)

    # --- parameter prep (tiny, one-time): pad hidden width to a lane-friendly
    # size. Zero-padded columns produce ReLU(0) = 0 activations and the padded
    # rows of W2 / W3 are zero, so the result is bit-identical to the unpadded
    # computation.
    Hp = _round_up(H, 128)
    ph = Hp - H
    w1 = jnp.pad(params["w1"], ((0, 0), (0, ph)))                    # (D, Hp)
    b1 = jnp.pad(params["b1"], ((0, ph),)).reshape(1, Hp)            # (1, Hp)
    w2 = jnp.pad(params["w2"], ((0, ph), (0, ph)))                   # (Hp, Hp)
    b2 = jnp.pad(params["b2"], ((0, ph),)).reshape(1, Hp)            # (1, Hp)
    w3 = jnp.pad(params["w3"].reshape(1, H), ((0, 0), (0, ph)))      # (1, Hp) row
    b3 = params["b3"].reshape(1, 1)                                  # (1, 1)
    # D itself is left unpadded: it is the contraction dim of layer 1 only, the
    # MXU handles a short K fine, and padding it would need a wrapper-side pass
    # over the batch-scaled x array (more HBM traffic than it saves).

    # --- batch tiling.
    if B <= block_b:
        TB = B                      # single tile: block == full array, always legal
    else:
        TB = block_b                # multiple of 128 -> legal (TB, D) / (1, TB) blocks
    grid = (pl.cdiv(B, TB),)

    const = lambda i: (0, 0)        # weights/biases stay resident across batch tiles

    flops = 2 * B * (D * Hp + Hp * Hp + Hp)
    out = pl.pallas_call(
        _make_value_head_kernel(relu_clipping),
        out_shape=jax.ShapeDtypeStruct((1, B), x.dtype),
        grid=grid,
        in_specs=[
            pl.BlockSpec((TB, D), lambda i: (i, 0)),   # x: streamed / pipelined
            pl.BlockSpec((D, Hp), const),              # w1
            pl.BlockSpec((1, Hp), const),              # b1
            pl.BlockSpec((Hp, Hp), const),             # w2
            pl.BlockSpec((1, Hp), const),              # b2
            pl.BlockSpec((1, Hp), const),              # w3 (row)
            pl.BlockSpec((1, 1), const),               # b3
        ],
        out_specs=pl.BlockSpec((1, TB), lambda i: (0, i)),   # lane-dense output
        compiler_params=pltpu.CompilerParams(
            dimension_semantics=("parallel",),         # v7x megacore sharding; no-op on v5e/v6e
        ),
        cost_estimate=pl.CostEstimate(
            flops=flops,
            transcendentals=0,
            bytes_accessed=4 * (B * D + B + D * Hp + Hp * Hp + 2 * Hp + Hp + 1),
        ),
    )(x, w1, b1, w2, b2, w3, b3)

    # (1, B) -> (B, 1); the leading dim is 1 so this reshape is layout-free.
    return out.reshape(B, 1)


def init_value_head_params(key, latent_dimension: int):
    """Deterministic synthetic parameters matching the PyTorch module's shapes."""
    D = latent_dimension
    H = 2 * D
    k = jax.random.split(key, 6)
    scale1 = 1.0 / jnp.sqrt(D)
    scale2 = 1.0 / jnp.sqrt(H)
    return {
        "w1": jax.random.uniform(k[0], (D, H), jnp.float32, -scale1, scale1),
        "b1": jax.random.uniform(k[1], (H,), jnp.float32, -scale1, scale1),
        "w2": jax.random.uniform(k[2], (H, H), jnp.float32, -scale2, scale2),
        "b2": jax.random.uniform(k[3], (H,), jnp.float32, -scale2, scale2),
        "w3": jax.random.uniform(k[4], (H, 1), jnp.float32, -scale2, scale2),
        "b3": jax.random.uniform(k[5], (1,), jnp.float32, -scale2, scale2),
    }


def value_head_reference(x, params, *, relu_clipping: bool = False):
    h1 = jnp.maximum(x @ params["w1"] + params["b1"], 0.0)
    h2 = jnp.maximum(h1 @ params["w2"] + params["b2"], 0.0)
    val = h2 @ params["w3"] + params["b3"]
    if relu_clipping:
        val = jnp.maximum(val, 0.0)
    return val


if __name__ == "__main__":
    latent_dimension = 32   # config.problem_specifics['latent_dimension']
    relu_clipping = True    # corresponds to config.objective_clipping[0] == 0

    key = jax.random.PRNGKey(0)
    pkey, xkey_small, xkey_big = jax.random.split(key, 3)
    params = init_value_head_params(pkey, latent_dimension)

    # Tiny batch (as in self-play inference): single-tile path.
    x_small = jax.random.normal(xkey_small, (2, latent_dimension), jnp.float32)
    out_small = jax.block_until_ready(
        value_head_forward(x_small, params, relu_clipping=relu_clipping))
    ref_small = value_head_reference(x_small, params, relu_clipping=relu_clipping)
    assert out_small.shape == (2, 1), out_small.shape
    assert jnp.allclose(out_small, ref_small, atol=1e-4, rtol=1e-4), (out_small, ref_small)

    # Larger batch: exercises the tiled, pipelined, megacore-parallel path
    # (including a non-multiple-of-tile batch so partial-block writeback runs).
    x_big = jax.random.normal(xkey_big, (1024 + 192, latent_dimension), jnp.float32)
    out_big = jax.block_until_ready(
        value_head_forward(x_big, params, relu_clipping=relu_clipping))
    ref_big = value_head_reference(x_big, params, relu_clipping=relu_clipping)
    assert out_big.shape == (1024 + 192, 1), out_big.shape
    assert jnp.allclose(out_big, ref_big, atol=1e-4, rtol=1e-4)

    # No final ReLU clipping path.
    out_nc = jax.block_until_ready(
        value_head_forward(x_small, params, relu_clipping=False))
    ref_nc = value_head_reference(x_small, params, relu_clipping=False)
    assert jnp.allclose(out_nc, ref_nc, atol=1e-4, rtol=1e-4)

    print("KERNEL_OK")
</pallas_src>

<mosaic_0001>
module attributes {stable_mosaic.version = 11 : i64} {
  func.func @kernel(%arg0: i32, %arg1: memref<2x32xf32, #tpu.memory_space<vmem>>, %arg2: memref<32x128xf32, #tpu.memory_space<vmem>>, %arg3: memref<1x128xf32, #tpu.memory_space<vmem>>, %arg4: memref<128x128xf32, #tpu.memory_space<vmem>>, %arg5: memref<1x128xf32, #tpu.memory_space<vmem>>, %arg6: memref<1x128xf32, #tpu.memory_space<vmem>>, %arg7: memref<1x1xf32, #tpu.memory_space<vmem>>, %arg8: memref<1x2xf32, #tpu.memory_space<vmem>>) attributes {dimension_semantics = [#tpu.dimension_semantics<parallel>], iteration_bounds = array<i64: 1>, scalar_prefetch = 0 : i64, scratch_operands = 0 : i64, tpu.core_type = #tpu.core_type<tc>, window_params = [{transform_indices = @transform_0, window_bounds = array<i64: 2, 32>}, {pipeline_mode = #tpu.pipeline_mode<synchronous>, transform_indices = @transform_1, window_bounds = array<i64: 32, 128>}, {pipeline_mode = #tpu.pipeline_mode<synchronous>, transform_indices = @transform_2, window_bounds = array<i64: 1, 128>}, {pipeline_mode = #tpu.pipeline_mode<synchronous>, transform_indices = @transform_3, window_bounds = array<i64: 128, 128>}, {pipeline_mode = #tpu.pipeline_mode<synchronous>, transform_indices = @transform_4, window_bounds = array<i64: 1, 128>}, {pipeline_mode = #tpu.pipeline_mode<synchronous>, transform_indices = @transform_5, window_bounds = array<i64: 1, 128>}, {pipeline_mode = #tpu.pipeline_mode<synchronous>, transform_indices = @transform_6, window_bounds = array<i64: 1, 1>}, {transform_indices = @transform_7, window_bounds = array<i64: 1, 2>}]} {
    %c0 = arith.constant 0 : index
    %c0_0 = arith.constant 0 : index
    %0 = vector.load %arg1[%c0, %c0_0] : memref<2x32xf32, #tpu.memory_space<vmem>>, vector<2x32xf32>
    %c0_1 = arith.constant 0 : index
    %c0_2 = arith.constant 0 : index
    %1 = vector.load %arg2[%c0_1, %c0_2] : memref<32x128xf32, #tpu.memory_space<vmem>>, vector<32x128xf32>
    %cst = arith.constant dense<0.000000e+00> : vector<2x128xf32>
    %2 = tpu.matmul %0, %1, %cst {dimension_numbers = #tpu.dot_dimension_numbers<[1], [0], [0], [1], [0, 0, 1, 1], [], []>} : vector<2x32xf32>, vector<32x128xf32>, vector<2x128xf32> -> vector<2x128xf32>
    %c0_3 = arith.constant 0 : index
    %c0_4 = arith.constant 0 : index
    %3 = vector.load %arg3[%c0_3, %c0_4] : memref<1x128xf32, #tpu.memory_space<vmem>>, vector<1x128xf32>
    %4 = vector.broadcast %3 : vector<1x128xf32> to vector<2x128xf32>
    %5 = arith.addf %2, %4 : vector<2x128xf32>
    %cst_5 = arith.constant 0.000000e+00 : f32
    %6 = vector.broadcast %cst_5 : f32 to vector<2x128xf32>
    %7 = arith.maximumf %5, %6 : vector<2x128xf32>
    %c0_6 = arith.constant 0 : index
    %c0_7 = arith.constant 0 : index
    %8 = vector.load %arg4[%c0_6, %c0_7] : memref<128x128xf32, #tpu.memory_space<vmem>>, vector<128x128xf32>
    %cst_8 = arith.constant dense<0.000000e+00> : vector<2x128xf32>
    %9 = tpu.matmul %7, %8, %cst_8 {dimension_numbers = #tpu.dot_dimension_numbers<[1], [0], [0], [1], [0, 0, 1, 1], [], []>} : vector<2x128xf32>, vector<128x128xf32>, vector<2x128xf32> -> vector<2x128xf32>
    %c0_9 = arith.constant 0 : index
    %c0_10 = arith.constant 0 : index
    %10 = vector.load %arg5[%c0_9, %c0_10] : memref<1x128xf32, #tpu.memory_space<vmem>>, vector<1x128xf32>
    %11 = vector.broadcast %10 : vector<1x128xf32> to vector<2x128xf32>
    %12 = arith.addf %9, %11 : vector<2x128xf32>
    %cst_11 = arith.constant 0.000000e+00 : f32
    %13 = vector.broadcast %cst_11 : f32 to vector<2x128xf32>
    %14 = arith.maximumf %12, %13 : vector<2x128xf32>
    %c0_12 = arith.constant 0 : index
    %c0_13 = arith.constant 0 : index
    %15 = vector.load %arg6[%c0_12, %c0_13] : memref<1x128xf32, #tpu.memory_space<vmem>>, vector<1x128xf32>
    %cst_14 = arith.constant dense<0.000000e+00> : vector<1x2xf32>
    %16 = tpu.matmul %15, %14, %cst_14 {dimension_numbers = #tpu.dot_dimension_numbers<[1], [1], [0], [0], [0, 0, 1, 0], [], []>} : vector<1x128xf32>, vector<2x128xf32>, vector<1x2xf32> -> vector<1x2xf32>
    %c0_15 = arith.constant 0 : index
    %c0_16 = arith.constant 0 : index
    %17 = vector.load %arg7[%c0_15, %c0_16] : memref<1x1xf32, #tpu.memory_space<vmem>>, vector<1x1xf32>
    %18 = vector.broadcast %17 : vector<1x1xf32> to vector<1x2xf32>
    %19 = arith.addf %16, %18 : vector<1x2xf32>
    %cst_17 = arith.constant 0.000000e+00 : f32
    %20 = vector.broadcast %cst_17 : f32 to vector<1x2xf32>
    %21 = arith.maximumf %19, %20 : vector<1x2xf32>
    %c0_18 = arith.constant 0 : index
    %c0_19 = arith.constant 0 : index
    %22 = vector.load %arg8[%c0_18, %c0_19] : memref<1x2xf32, #tpu.memory_space<vmem>>, vector<1x2xf32>
    tpu.vector_store %arg8[%c0_18, %c0_19], %21 {strides = array<i32>} : memref<1x2xf32, #tpu.memory_space<vmem>>, vector<1x2xf32>,
    return
  }
  func.func @transform_0(%arg0: i32) -> (i32, i32) {
    %c0_i32 = arith.constant 0 : i32
    %c0_i32_0 = arith.constant 0 : i32
    return %arg0, %c0_i32 : i32, i32
  }
  func.func @transform_1(%arg0: i32) -> (i32, i32) {
    %c0_i32 = arith.constant 0 : i32
    %c0_i32_0 = arith.constant 0 : i32
    %c0_i32_1 = arith.constant 0 : i32
    return %c0_i32, %c0_i32_0 : i32, i32
  }
  func.func @transform_2(%arg0: i32) -> (i32, i32) {
    %c0_i32 = arith.constant 0 : i32
    %c0_i32_0 = arith.constant 0 : i32
    %c0_i32_1 = arith.constant 0 : i32
    return %c0_i32, %c0_i32_0 : i32, i32
  }
  func.func @transform_3(%arg0: i32) -> (i32, i32) {
    %c0_i32 = arith.constant 0 : i32
    %c0_i32_0 = arith.constant 0 : i32
    %c0_i32_1 = arith.constant 0 : i32
    return %c0_i32, %c0_i32_0 : i32, i32
  }
  func.func @transform_4(%arg0: i32) -> (i32, i32) {
    %c0_i32 = arith.constant 0 : i32
    %c0_i32_0 = arith.constant 0 : i32
    %c0_i32_1 = arith.constant 0 : i32
    return %c0_i32, %c0_i32_0 : i32, i32
  }
  func.func @transform_5(%arg0: i32) -> (i32, i32) {
    %c0_i32 = arith.constant 0 : i32
    %c0_i32_0 = arith.constant 0 : i32
    %c0_i32_1 = arith.constant 0 : i32
    return %c0_i32, %c0_i32_0 : i32, i32
  }
  func.func @transform_6(%arg0: i32) -> (i32, i32) {
    %c0_i32 = arith.constant 0 : i32
    %c0_i32_0 = arith.constant 0 : i32
    %c0_i32_1 = arith.constant 0 : i32
    return %c0_i32, %c0_i32_0 : i32, i32
  }
  func.func @transform_7(%arg0: i32) -> (i32, i32) {
    %c0_i32 = arith.constant 0 : i32
    %c0_i32_0 = arith.constant 0 : i32
    return %c0_i32, %arg0 : i32, i32
  }
}

</mosaic_0001>

<bundles_post_ra>
// kernel: tpu_custom_call.1
= control target key start
LH: loop header
LB: loop body
LE: loop exit
PB: predicated region body
PF: predicated region fallthrough
CT: control target
= control target key end

     0   :  { %s631_s0 = inlined_call_operand.vmem [shape: f32[2,32], index: 0, kind: input, shape index: {}]   ;;  %s632_s1 = inlined_call_operand.hbm [shape: f32[32,128], index: 1, kind: input, shape index: {}]   ;;  %s633_s2 = inlined_call_operand.vmem [shape: f32[1,128], index: 2, kind: input, shape index: {}]   ;;  %s634_s3 = inlined_call_operand.hbm [shape: f32[128,128], index: 3, kind: input, shape index: {}]   ;;  %s635_s4 = inlined_call_operand.vmem [shape: f32[1,128], index: 4, kind: input, shape index: {}]   ;;  %s636_s5 = inlined_call_operand.vmem [shape: f32[1,128], index: 5, kind: input, shape index: {}]   ;;  %s637_s6 = inlined_call_operand.<no memory space> [shape: f32[1,1], index: 6, kind: input, shape index: {}]   ;;  %s638_s7 = inlined_call_operand.hbm [shape: f32[1,2], index: 7, kind: output, shape index: {}]  }
   0x1   :  { %v12_v0 = vstv %s637_s6 }
   0x2   :  { %13 = vst [vmem:[#allocation2] sm:$0x1] %v12_v0 }
   0x3   :  { %14 = vsyncpa [#allocation4], 0 }
   0x4   :  { %15 = vsyncpa [#allocation7], 0 }
   0x5   :  { %16 = vsyncpa [#allocation5], 0  ;;  %s528_s26 = smov [#allocation3]   ;;  %s456_s30 = scalar_lea.hbm %s632_s1, 512 }
   0x6   :  { %s24_s27 = sshll.u32 %s528_s26, 4  ;;  %p457_p0 = scmp.ne.s32.totalorder %s632_s1, %s456_s30  ;;  %s25_s27 = int_to_ptr.vmem [resolvable:$true] %s24_s27 }
   0x7   :  { %p460_p1 = scmp.lt.u32.totalorder %s456_s30, %s632_s1 }
   0x9   :  { %p462_p2 = pnand %p460_p1, %p457_p0 }
   0xb   :  { %465 = shalt.err (!%p462_p2)
}
   0xc   :  { %s466_s6 = scalar_lea.vmem %s25_s27, 512  ;;  %p471_p4 = scmp.lt.s32.totalorder %s25_s27, %s25_s27 }
   0xd   :  { %p467_p3 = scmp.ne.s32.totalorder %s25_s27, %s466_s6  ;;  %p472_p5 = scmp.lt.s32.totalorder %s466_s6, %s466_s6 }
   0xf   :  { %p473_p6 = por %p472_p5, %p471_p4 }
  0x11   :  { %p474_p7 = pnand %p473_p6, %p467_p3 }
  0x13   :  { %477 = shalt.err (!%p474_p7)
}
  0x14   :  { %s529_s12 = smov 128   ;;  %s530_s13 = smov 8  }
  0x15   :  { %30 = dma.hbm_to_vmem [thread:$0]  %s632_s1, 512, %s25_s27, [#allocation4], %s529_s12, %s529_s12, %s530_s13  }
  0x16   :  { %s531_s16 = smov [#allocation6]   ;;  %s478_s20 = scalar_lea.hbm %s634_s3, 2048 }
  0x17   :  { %s38_s17 = sshll.u32 %s531_s16, 4  ;;  %p479_p8 = scmp.ne.s32.totalorder %s634_s3, %s478_s20  ;;  %s39_s17 = int_to_ptr.vmem [resolvable:$true] %s38_s17 }
  0x18   :  { %p482_p9 = scmp.lt.u32.totalorder %s478_s20, %s634_s3 }
  0x1a   :  { %p484_p10 = pnand %p482_p9, %p479_p8 }
  0x1c   :  { %487 = shalt.err (!%p484_p10)
}
  0x1d   :  { %s488_s25 = scalar_lea.vmem %s39_s17, 2048  ;;  %p493_p12 = scmp.lt.s32.totalorder %s39_s17, %s39_s17 }
  0x1e   :  { %p489_p11 = scmp.ne.s32.totalorder %s39_s17, %s488_s25  ;;  %p494_p13 = scmp.lt.s32.totalorder %s488_s25, %s488_s25 }
  0x20   :  { %p495_p0 = por %p494_p13, %p493_p12 }
  0x22   :  { %p496_p1 = pnand %p495_p0, %p489_p11 }
  0x24   :  { %499 = shalt.err (!%p496_p1)
}
  0x25   :  { %44 = dma.hbm_to_vmem [thread:$0]  %s634_s3, 2048, %s39_s17, [#allocation7], %s529_s12, %s529_s12, %s530_s13  }
  0x26   :  { %522 = dma.done.wait [#allocation4], 512  }
  0x27   :  { %523 = vsyncadd [#allocation4], 4294966784 }
  0x28   :  { %524 = dma.done.wait [#allocation7], 2048  }
  0x29   :  { %525 = vsyncadd [#allocation7], 4294965248  ;;  %v532_v1 = vmov 0.0|0.0   ;;  %vm533_vm0 = vmmov 0   ;;  %v534_v2 = vmov 0.0   ;;  %v58_v3 = vld [vmem:[#allocation3] sm:$0xff]  ;;  %v245_v47 = vlaneseq }
  0x2a   :  { %416 = vmatprep.subr.bf16.mxu0 %v532_v1  ;;  %373 = vmatprep.mubr.msk.f32.mxu0 %vm533_vm0, %v534_v2  ;;  %v59_v4 = vld [vmem:[#allocation3 + $0x8] sm:$0xff]  ;;  %v60_v5 = vld [vmem:[#allocation3 + $0x10] sm:$0xff]  ;;  %v61_v7 = vld [vmem:[#allocation3 + $0x18] sm:$0xff]  ;;  %vm69_vm1 = vcmask 261120   ;;  %v535_v40 = vmov 0   ;;  %s536_s9 = smov [#allocation8]  }
  0x2b   :  { %422 = vmatprep.subr.bf16.mxu1 %v532_v1  ;;  %408 = vmatprep.mubr.msk.f32.mxu1 %vm533_vm0, %v534_v2  ;;  %v417_v6 = vpack.c.bf16 %v59_v4, %v58_v3  ;;  %v144_v8 = vld [vmem:[#allocation6] sm:$0xff]  ;;  %v145_v9 = vld [vmem:[#allocation6 + $0x8] sm:$0xff]  ;;  %v146_v10 = vld [vmem:[#allocation6 + $0x10] sm:$0xff]  ;;  %v420_v12 = vpack.c.bf16 %v61_v7, %v60_v5  ;;  %v246_v48 = vshrl.u32 %v245_v47, 7  ;;  %s328_s10 = sshll.u32 %s536_s9, 4  ;;  %vm320_vm2 = vcmask 8192   ;;  %s329_s10 = int_to_ptr.vmem [resolvable:$true] %s328_s10 }
  0x2c   :  { %v147_v11 = vld [vmem:[#allocation6 + $0x18] sm:$0xff]  ;;  %v423_v13 = vpack.c.bf16 %v145_v9, %v144_v8  ;;  %v148_v15 = vld [vmem:[#allocation6 + $0x20] sm:$0xff]  ;;  %v149_v16 = vld [vmem:[#allocation6 + $0x28] sm:$0xff]  ;;  %455 = vset.pattern.permute.xlu0 %v535_v40  ;;  %s504_s11 = scalar_lea.vmem %s329_s10, 32  ;;  %p505_p3 = scmp.lt.s32.totalorder %s329_s10, %s329_s10 }
  0x2d   :  { %418 = vmatpush3.bf16.msra.mxu0 %v417_v6  ;;  %v426_v14 = vpack.c.bf16 %v147_v11, %v146_v10  ;;  %v57_v17 = vld [vmem:[%s631_s0] sm:$0x3]  ;;  %v429_v18 = vpack.c.bf16 %v149_v16, %v148_v15  ;;  %v150_v19 = vld [vmem:[#allocation6 + $0x30] sm:$0xff]  ;;  %v153_v23 = vld [vmem:[#allocation6 + $0x48] sm:$0xff]  ;;  %v247_v49 = vsub.s32 0, %v246_v48 }
  0x2e   :  { %419 = vmatprep.subr.bf16.mxu0 %v532_v1  ;;  %424 = vmatpush3.bf16.msra.mxu1 %v423_v13  ;;  %v151_v20 = vld [vmem:[#allocation6 + $0x38] sm:$0xff]  ;;  %v152_v22 = vld [vmem:[#allocation6 + $0x40] sm:$0xff]  ;;  %v154_v25 = vld [vmem:[#allocation6 + $0x50] sm:$0xff] }
  0x2f   :  { %425 = vmatprep.subr.bf16.mxu1 %v532_v1  ;;  %v432_v21 = vpack.c.bf16 %v151_v20, %v150_v19  ;;  %v435_v24 = vpack.c.bf16 %v153_v23, %v152_v22  ;;  %v155_v26 = vld [vmem:[#allocation6 + $0x58] sm:$0xff]  ;;  %v156_v28 = vld [vmem:[#allocation6 + $0x60] sm:$0xff]  ;;  %v157_v29 = vld [vmem:[#allocation6 + $0x68] sm:$0xff] }
  0x30   :  { %v438_v27 = vpack.c.bf16 %v155_v26, %v154_v25  ;;  %v441_v30 = vpack.c.bf16 %v157_v29, %v156_v28  ;;  %v158_v31 = vld [vmem:[#allocation6 + $0x70] sm:$0xff]  ;;  %v159_v32 = vld [vmem:[#allocation6 + $0x78] sm:$0xff] }
  0x31   :  { %421 = vmatpush3.bf16.msra.mxu0 %v420_v12  ;;  %v444_v33 = vpack.c.bf16 %v159_v32, %v158_v31  ;;  %v338_v34 = vld [vmem:[%s633_s2] ss:$0 sm:$0xff] }
  0x32   :  { %411 = vmatprep.subr.mxu0 %v534_v2  ;;  %427 = vmatpush3.bf16.msra.mxu1 %v426_v14  ;;  %v239_v39 = vld [vmem:[#allocation2] sm:$0x1] }
  0x33   :  { %428 = vmatprep.subr.bf16.mxu1 %v532_v1  ;;  %242 = vperm.xlu0 %455, %v239_v39   ;;  %v340_v41 = vld [vmem:[%s635_s4] ss:$0 sm:$0xff]  ;;  %s500_s4 = scalar_lea.vmem %s329_s10, 16 }
  0x34   :  { %374 = vmatmul.mubr.msk.f32.vlgmr.msra.gmra.mrb[0].mxu0 %vm69_vm1, %v57_v17  ;;  %v238_v46 = vld [vmem:[%s636_s5] sm:$0x1]  ;;  %p501_p2 = scmp.ne.s32.totalorder %s329_s10, %s500_s4  ;;  %p506_p4 = scmp.lt.s32.totalorder %s504_s11, %s500_s4 }
  0x35   :  { %413 = vmatprep.mubr.msk.f32.mxu0 %vm533_vm0, %v534_v2 }
  0x36   :  { %430 = vmatpush3.bf16.msra.mxu1 %v429_v18  ;;  %p507_p5 = por %p506_p4, %p505_p3 }
  0x37   :  { %431 = vmatprep.subr.bf16.mxu1 %v532_v1 }
  0x38   :  { %p508_p6 = pnand %p507_p5, %p501_p2 }
  0x3a   :  { %433 = vmatpush3.bf16.msra.mxu1 %v432_v21 }
  0x3b   :  { %434 = vmatprep.subr.bf16.mxu1 %v532_v1 }
  0x3e   :  { %436 = vmatpush3.bf16.msra.mxu1 %v435_v24 }
  0x3f   :  { %437 = vmatprep.subr.bf16.mxu1 %v532_v1 }
  0x42   :  { %439 = vmatpush3.bf16.msra.mxu1 %v438_v27 }
  0x43   :  { %440 = vmatprep.subr.bf16.mxu1 %v532_v1 }
  0x46   :  { %442 = vmatpush3.bf16.msra.mxu1 %v441_v30 }
  0x47   :  { %443 = vmatprep.subr.bf16.mxu1 %v532_v1 }
  0x4a   :  { %445 = vmatpush3.bf16.msra.mxu1 %v444_v33 }
  0xb2   :  { %v243_v50 = vpop.permute.xlu0 %242 }
  0xb3   :  { %v248_v51 = vrot.slane %v243_v50, %v247_v49 }
 0x107   :  { %v139_v35 = vpop.f32.mrb[0].mxu0 }
 0x108   :  { %v140_v36 = vadd.f32 %v338_v34, %v139_v35  ;;  %v375_v37 = vpop.f32.mrb[1].mxu0 }
 0x10a   :  { %v143_v38 = vmax.f32 %v140_v36, 0.0 }
 0x10c   :  { %409 = vmatmul.mubr.f32.vlgmr.msra.gmra.mrb[0].mxu1 %v143_v38 }
 0x1df   :  { %v233_v42 = vpop.f32.mrb[0].mxu1 }
 0x1e0   :  { %v234_v43 = vadd.f32 %v340_v41, %v233_v42  ;;  %v410_v44 = vpop.f32.mrb[1].mxu1 }
 0x1e2   :  { %v237_v45 = vmax.f32 %v234_v43, 0.0 }
 0x1e4   :  { %412 = vmatpush3.xpose.msra.mxu0 %v237_v45 }
 0x1e7   :  { %414 = vmatmul.mubr.f32.vlgmr.msra.gmra.mrb[2].mxu0 %v238_v46 }
 0x2ba   :  { %v315_v52 = vpop.f32.mrb[2].mxu0 }
 0x2bb   :  { %v316_v53 = vadd.f32 %v315_v52, %v248_v51  ;;  %v415_v54 = vpop.f32.mrb[3].mxu0 }
 0x2bd   :  { %v319_v55 = vmax.f32 %v316_v53, 0.0 }
 0x2bf   :  { %321 = vst.msk [vmem:[#allocation8] sm:$0x1] %vm320_vm2, %v319_v55 }
 0x2c0   :  { %511 = shalt.err (!%p508_p6)
}
 0x2c1   :  { %s512_s12 = scalar_lea.hbm %s638_s7, 16 }
 0x2c2   :  { %p513_p7 = scmp.ne.s32.totalorder %s638_s7, %s512_s12  ;;  %p516_p8 = scmp.lt.u32.totalorder %s512_s12, %s638_s7 }
 0x2c4   :  { %p518_p9 = pnand %p516_p8, %p513_p7 }
 0x2c6   :  { %521 = shalt.err (!%p518_p9)
}
 0x2c7   :  { %331 = dma.vmem_to_hbm [thread:$0]  %s329_s10, 16, %s638_s7, [#allocation5]  }
 0x2c8   :  { %526 = dma.done.wait [#allocation5], 16  }
 0x2c9   :  { %527 = vsyncadd [#allocation5], 4294967280 }
 0x2ca   :  { %335 = vsyncpa [#allocation4], 1 }
 0x2cb   :  { %336 = vsyncpa [#allocation7], 1 }
 0x2cc   :  { %337 = vsyncpa [#allocation5], 1 }

</bundles_post_ra>
